<compile_context>
chip_gen: v7x
topology: tpu7x:2x2x1
jax: 0.10.0
libtpu: 0.0.40
codegen_flags: <defaults>
</compile_context>

<pallas_src>
import functools
import math

import jax
import jax.numpy as jnp
from jax.experimental import pallas as pl
from jax.experimental.pallas import tpu as pltpu


# ----------------------------- configuration --------------------------------
CONFIG = {
    "num_users": 32,
    "num_items": 64,
    "latent_dim_mf": 8,
    "latent_dim_mlp": 8,
    "layers": [16, 32, 16, 8],   # layers[0] == 2 * latent_dim_mlp
    "weight_init_gaussian": True,
}

BATCH = 16   # whole batch handled in one grid step


def _round8(x):
    return (x + 7) // 8 * 8


def _packed_layout(config):
    """Static row/col offsets inside the single packed slab.

    Columns [0, tbl_cols)       : embedding table rows (user rows then item rows)
    Columns [tbl_cols, n_cols)  : fc weights / biases / affine head
    """
    layers = config["layers"]
    d_mlp, d_mf = config["latent_dim_mlp"], config["latent_dim_mf"]
    nu, ni = config["num_users"], config["num_items"]
    aff_in = layers[-1] + d_mf
    tbl_cols = 2 * (d_mlp + d_mf)          # [u_mlp | i_mlp | u_mf | i_mf]

    w_col0 = tbl_cols                       # weight block lives right of the table
    w_cols = max(max(layers), aff_in + 1)

    w_rows, row = [], 0
    for in_s in layers[:-1]:                # fc weight blocks, 8-row aligned
        w_rows.append(row)
        row += _round8(in_s)
    b_rows = []                             # compact: one row per bias
    for _ in layers[1:]:
        b_rows.append(row)
        row += 1
    aff_row = row                           # affine weights + bias in one row
    row += 1

    return {
        "w_rows": tuple(w_rows),
        "b_rows": tuple(b_rows),
        "aff_row": aff_row,
        "w_col0": w_col0,
        "tbl_cols": tbl_cols,
        "n_rows": max(nu + ni, row),
        "n_cols": w_col0 + w_cols,
    }


# ------------------------------- kernel -------------------------------------
def neumf_kernel(idx_ref, slab_ref, out_ref, *, num_users, num_rows_tbl,
                 d_mlp, d_mf, layers, layout):
    """Fused NeuMF forward for the whole batch (single grid step).

    idx_ref  : VMEM int32[batch, 2]        (col 0 = user idx, col 1 = item idx)
    slab_ref : VMEM f32[n_rows, n_cols]    packed embeddings + fc/affine weights
    out_ref  : VMEM f32[batch, 1]          sigmoid rating
    """
    batch = idx_ref.shape[0]
    c0 = layout["w_col0"]

    # ---- fused embedding gather as ONE one-hot MXU matmul --------------------
    # user rows:  [u_mlp |  0    | u_mf |  0  ]
    # item rows:  [ 0    | i_mlp |  0   | i_mf]
    # one_hot selects one user row AND one item row per example, so the matmul
    # directly produces  [u_mlp | i_mlp | u_mf | i_mf]  (the torch.cat for
    # layer 0 disappears).
    u = idx_ref[:, 0:1]                                           # (B, 1) int32
    it = idx_ref[:, 1:2]                                          # (B, 1) int32
    row_ids = jax.lax.broadcasted_iota(jnp.int32, (batch, num_rows_tbl), 1)
    one_hot = jnp.logical_or(row_ids == u,
                             row_ids == it + num_users).astype(jnp.float32)
    tbl = slab_ref[0:num_rows_tbl, 0:layout["tbl_cols"]]
    gathered = jnp.dot(one_hot, tbl, preferred_element_type=jnp.float32)

    h = gathered[:, 0:2 * d_mlp]                                  # concat(u_mlp, i_mlp)
    mf = (gathered[:, 2 * d_mlp:2 * d_mlp + d_mf]                 # GMF branch
          * gathered[:, 2 * d_mlp + d_mf:2 * d_mlp + 2 * d_mf])

    # ---- MLP tower: one MXU dot per layer ------------------------------------
    for li, (in_s, out_s) in enumerate(zip(layers[:-1], layers[1:])):
        wr = layout["w_rows"][li]
        br = layout["b_rows"][li]
        w = slab_ref[wr:wr + in_s, c0:c0 + out_s]
        bias = slab_ref[br:br + 1, c0:c0 + out_s]
        h = jnp.dot(h, w, preferred_element_type=jnp.float32) + bias
        h = jnp.maximum(h, 0.0)

    # ---- affine head (out_features == 1) on VPU/XLU, not the MXU --------------
    ar = layout["aff_row"]
    m = layers[-1]
    wa_mlp = slab_ref[ar:ar + 1, c0:c0 + m]
    wa_mf = slab_ref[ar:ar + 1, c0 + m:c0 + m + d_mf]
    ba = slab_ref[ar:ar + 1, c0 + m + d_mf:c0 + m + d_mf + 1]
    logits = (jnp.sum(h * wa_mlp, axis=-1, keepdims=True)
              + jnp.sum(mf * wa_mf, axis=-1, keepdims=True)
              + ba)

    # TODO(synk): output stays [batch, 1] to match the module; switch to a
    # lane-dense layout (e.g. (1, B) slab) only if batch is scaled up.
    out_ref[...] = jax.nn.sigmoid(logits)


# ------------------------------- wrapper -------------------------------------
def pack_params(params, config):
    """One-time repack of NeuMF parameters into the single fused slab."""
    lay = _packed_layout(config)
    d_mlp, d_mf = config["latent_dim_mlp"], config["latent_dim_mf"]
    nu, ni = config["num_users"], config["num_items"]
    layers = config["layers"]
    assert layers[0] == 2 * d_mlp
    c0 = lay["w_col0"]

    slab = jnp.zeros((lay["n_rows"], lay["n_cols"]), jnp.float32)

    # embedding table (user rows then item rows, disjoint column blocks)
    slab = slab.at[0:nu, 0:d_mlp].set(params["emb_user_mlp"])
    slab = slab.at[0:nu, 2 * d_mlp:2 * d_mlp + d_mf].set(params["emb_user_mf"])
    slab = slab.at[nu:nu + ni, d_mlp:2 * d_mlp].set(params["emb_item_mlp"])
    slab = slab.at[nu:nu + ni,
                   2 * d_mlp + d_mf:2 * (d_mlp + d_mf)].set(params["emb_item_mf"])

    # fc weights + biases
    for li, (in_s, out_s) in enumerate(zip(layers[:-1], layers[1:])):
        wr, br = lay["w_rows"][li], lay["b_rows"][li]
        slab = slab.at[wr:wr + in_s, c0:c0 + out_s].set(params[f"fc{li}_w"])
        slab = slab.at[br, c0:c0 + out_s].set(params[f"fc{li}_b"][0])

    # affine head (weights + bias in one row)
    ar, m = lay["aff_row"], layers[-1]
    slab = slab.at[ar, c0:c0 + m + d_mf].set(params["aff_w"][:, 0])
    slab = slab.at[ar, c0 + m + d_mf].set(params["aff_b"][0, 0])
    return {"slab": slab}


def make_neumf_forward(config):
    lay = _packed_layout(config)
    d_mlp, d_mf = config["latent_dim_mlp"], config["latent_dim_mf"]
    layers = tuple(config["layers"])
    nu, ni = config["num_users"], config["num_items"]

    kernel = functools.partial(
        neumf_kernel, num_users=nu, num_rows_tbl=nu + ni,
        d_mlp=d_mlp, d_mf=d_mf, layers=layers, layout=lay)

    @jax.jit
    def forward(packed, user_indices, item_indices):
        slab = packed["slab"]
        batch = user_indices.shape[0]

        # Clamp so a bad id can never address an unintended row.
        u = jnp.clip(user_indices.astype(jnp.int32), 0, nu - 1)
        it = jnp.clip(item_indices.astype(jnp.int32), 0, ni - 1)
        idx = jnp.stack([u, it], axis=-1)          # (B, 2) int32, one DMA stream

        # TODO(synk): if batch is scaled up (>= ~128), tile it over a
        # "parallel" grid axis so v7x's second TensorCore is used.
        return pl.pallas_call(
            kernel,
            out_shape=jax.ShapeDtypeStruct((batch, 1), jnp.float32),
            grid=(1,),                             # single step: no per-step overhead
            in_specs=[
                pl.BlockSpec((batch, 2), lambda i: (0, 0)),
                pl.BlockSpec(slab.shape, lambda i: (0, 0)),
            ],
            out_specs=pl.BlockSpec((batch, 1), lambda i: (0, 0)),
            compiler_params=pltpu.CompilerParams(
                dimension_semantics=("arbitrary",)),
        )(idx, slab)

    return forward


# --------------------------- parameter init ----------------------------------
def init_params(key, config):
    """N(0, 0.01) weights (weight_init_gaussian); biases keep the PyTorch
    Linear default U(-1/sqrt(in), 1/sqrt(in)) since torch only re-inits .weight."""
    nu, ni = config["num_users"], config["num_items"]
    d_mlp, d_mf = config["latent_dim_mlp"], config["latent_dim_mf"]
    layers = config["layers"]

    keys = jax.random.split(key, 20)
    std = 0.01

    params = {
        "emb_user_mlp": std * jax.random.normal(keys[0], (nu, d_mlp), jnp.float32),
        "emb_item_mlp": std * jax.random.normal(keys[1], (ni, d_mlp), jnp.float32),
        "emb_user_mf":  std * jax.random.normal(keys[2], (nu, d_mf), jnp.float32),
        "emb_item_mf":  std * jax.random.normal(keys[3], (ni, d_mf), jnp.float32),
    }

    # fc layers: PyTorch Linear weight is [out, in]; stored here as [in, out].
    for idx, (in_size, out_size) in enumerate(zip(layers[:-1], layers[1:])):
        w = std * jax.random.normal(keys[4 + 2 * idx], (out_size, in_size), jnp.float32)
        bound = 1.0 / math.sqrt(in_size)
        b = jax.random.uniform(keys[5 + 2 * idx], (1, out_size), jnp.float32,
                               minval=-bound, maxval=bound)
        params[f"fc{idx}_w"] = jnp.transpose(w)               # [in, out]
        params[f"fc{idx}_b"] = b

    aff_in = layers[-1] + d_mf
    wa = std * jax.random.normal(keys[16], (1, aff_in), jnp.float32)
    bound = 1.0 / math.sqrt(aff_in)
    params["aff_w"] = jnp.transpose(wa)                       # [aff_in, 1]
    params["aff_b"] = jax.random.uniform(keys[17], (1, 1), jnp.float32,
                                         minval=-bound, maxval=bound)
    return params


# ------------------------- pure-JAX reference --------------------------------
def neumf_reference(params, user_indices, item_indices, config):
    u_mlp = params["emb_user_mlp"][user_indices]
    i_mlp = params["emb_item_mlp"][item_indices]
    u_mf = params["emb_user_mf"][user_indices]
    i_mf = params["emb_item_mf"][item_indices]

    mlp = jnp.concatenate([u_mlp, i_mlp], axis=-1)
    mf = u_mf * i_mf
    n_fc = len(config["layers"]) - 1
    for idx in range(n_fc):
        mlp = jnp.maximum(mlp @ params[f"fc{idx}_w"] + params[f"fc{idx}_b"], 0.0)
    vec = jnp.concatenate([mlp, mf], axis=-1)
    logits = vec @ params["aff_w"] + params["aff_b"]
    return jax.nn.sigmoid(logits)


# --------------------------------- main ---------------------------------------
if __name__ == "__main__":
    key = jax.random.PRNGKey(0)
    pkey, ukey, ikey = jax.random.split(key, 3)

    params = init_params(pkey, CONFIG)
    packed = pack_params(params, CONFIG)

    user_indices = jax.random.randint(ukey, (BATCH,), 0, CONFIG["num_users"], dtype=jnp.int32)
    item_indices = jax.random.randint(ikey, (BATCH,), 0, CONFIG["num_items"], dtype=jnp.int32)

    neumf_forward = make_neumf_forward(CONFIG)
    rating = neumf_forward(packed, user_indices, item_indices)
    jax.block_until_ready(rating)

    ref = neumf_reference(params, user_indices, item_indices, CONFIG)
    assert rating.shape == (BATCH, 1), rating.shape
    assert jnp.allclose(rating, ref, atol=1e-5, rtol=1e-5), (rating, ref)

    print("KERNEL_OK")
</pallas_src>

<mosaic_0001>
module attributes {stable_mosaic.version = 11 : i64} {
  func.func @neumf_kernel(%arg0: i32, %arg1: memref<16x2xi32, #tpu.memory_space<vmem>>, %arg2: memref<96x64xf32, #tpu.memory_space<vmem>>, %arg3: memref<16x1xf32, #tpu.memory_space<vmem>>) attributes {dimension_semantics = [#tpu.dimension_semantics<arbitrary>], iteration_bounds = array<i64: 1>, scalar_prefetch = 0 : i64, scratch_operands = 0 : i64, tpu.core_type = #tpu.core_type<tc>, window_params = [{pipeline_mode = #tpu.pipeline_mode<synchronous>, transform_indices = @transform_0, window_bounds = array<i64: 16, 2>}, {pipeline_mode = #tpu.pipeline_mode<synchronous>, transform_indices = @transform_1, window_bounds = array<i64: 96, 64>}, {pipeline_mode = #tpu.pipeline_mode<synchronous>, transform_indices = @transform_2, window_bounds = array<i64: 16, 1>}]} {
    %c0 = arith.constant 0 : index
    %c0_0 = arith.constant 0 : index
    %0 = vector.load %arg1[%c0, %c0_0] : memref<16x2xi32, #tpu.memory_space<vmem>>, vector<16x1xi32>
    %c0_1 = arith.constant 0 : index
    %c1 = arith.constant 1 : index
    %1 = vector.load %arg1[%c0_1, %c1] : memref<16x2xi32, #tpu.memory_space<vmem>>, vector<16x1xi32>
    %2 = tpu.iota {dimensions = array<i32: 1>} : vector<16x96xi32>
    %3 = vector.broadcast %0 : vector<16x1xi32> to vector<16x96xi32>
    %4 = arith.cmpi eq, %2, %3 : vector<16x96xi32>
    %c32_i32 = arith.constant 32 : i32
    %5 = vector.broadcast %c32_i32 : i32 to vector<16x1xi32>
    %6 = arith.addi %1, %5 : vector<16x1xi32>
    %7 = vector.broadcast %6 : vector<16x1xi32> to vector<16x96xi32>
    %8 = arith.cmpi eq, %2, %7 : vector<16x96xi32>
    %9 = arith.ori %4, %8 : vector<16x96xi1>
    %10 = arith.extui %9 : vector<16x96xi1> to vector<16x96xi32>
    %11 = arith.sitofp %10 : vector<16x96xi32> to vector<16x96xf32>
    %c0_2 = arith.constant 0 : index
    %c0_3 = arith.constant 0 : index
    %12 = vector.load %arg2[%c0_2, %c0_3] : memref<96x64xf32, #tpu.memory_space<vmem>>, vector<96x32xf32>
    %cst = arith.constant dense<0.000000e+00> : vector<16x32xf32>
    %13 = tpu.matmul %11, %12, %cst {dimension_numbers = #tpu.dot_dimension_numbers<[1], [0], [0], [1], [0, 0, 1, 1], [], []>} : vector<16x96xf32>, vector<96x32xf32>, vector<16x32xf32> -> vector<16x32xf32>
    %14 = vector.extract_strided_slice %13 {offsets = [0, 0], sizes = [16, 16], strides = [1, 1]} : vector<16x32xf32> to vector<16x16xf32>
    %15 = vector.extract_strided_slice %13 {offsets = [0, 16], sizes = [16, 8], strides = [1, 1]} : vector<16x32xf32> to vector<16x8xf32>
    %16 = vector.extract_strided_slice %13 {offsets = [0, 24], sizes = [16, 8], strides = [1, 1]} : vector<16x32xf32> to vector<16x8xf32>
    %17 = arith.mulf %15, %16 : vector<16x8xf32>
    %c0_4 = arith.constant 0 : index
    %c32 = arith.constant 32 : index
    %18 = vector.load %arg2[%c0_4, %c32] : memref<96x64xf32, #tpu.memory_space<vmem>>, vector<16x32xf32>
    %c64 = arith.constant 64 : index
    %c32_5 = arith.constant 32 : index
    %19 = vector.load %arg2[%c64, %c32_5] : memref<96x64xf32, #tpu.memory_space<vmem>>, vector<1x32xf32>
    %cst_6 = arith.constant dense<0.000000e+00> : vector<16x32xf32>
    %20 = tpu.matmul %14, %18, %cst_6 {dimension_numbers = #tpu.dot_dimension_numbers<[1], [0], [0], [1], [0, 0, 1, 1], [], []>} : vector<16x16xf32>, vector<16x32xf32>, vector<16x32xf32> -> vector<16x32xf32>
    %21 = vector.broadcast %19 : vector<1x32xf32> to vector<16x32xf32>
    %22 = arith.addf %20, %21 : vector<16x32xf32>
    %cst_7 = arith.constant 0.000000e+00 : f32
    %23 = vector.broadcast %cst_7 : f32 to vector<16x32xf32>
    %24 = arith.maximumf %22, %23 : vector<16x32xf32>
    %c16 = arith.constant 16 : index
    %c32_8 = arith.constant 32 : index
    %25 = vector.load %arg2[%c16, %c32_8] : memref<96x64xf32, #tpu.memory_space<vmem>>, vector<32x16xf32>
    %c65 = arith.constant 65 : index
    %c32_9 = arith.constant 32 : index
    %26 = vector.load %arg2[%c65, %c32_9] : memref<96x64xf32, #tpu.memory_space<vmem>>, vector<1x16xf32>
    %cst_10 = arith.constant dense<0.000000e+00> : vector<16x16xf32>
    %27 = tpu.matmul %24, %25, %cst_10 {dimension_numbers = #tpu.dot_dimension_numbers<[1], [0], [0], [1], [0, 0, 1, 1], [], []>} : vector<16x32xf32>, vector<32x16xf32>, vector<16x16xf32> -> vector<16x16xf32>
    %28 = vector.broadcast %26 : vector<1x16xf32> to vector<16x16xf32>
    %29 = arith.addf %27, %28 : vector<16x16xf32>
    %cst_11 = arith.constant 0.000000e+00 : f32
    %30 = vector.broadcast %cst_11 : f32 to vector<16x16xf32>
    %31 = arith.maximumf %29, %30 : vector<16x16xf32>
    %c48 = arith.constant 48 : index
    %c32_12 = arith.constant 32 : index
    %32 = vector.load %arg2[%c48, %c32_12] : memref<96x64xf32, #tpu.memory_space<vmem>>, vector<16x8xf32>
    %c66 = arith.constant 66 : index
    %c32_13 = arith.constant 32 : index
    %33 = vector.load %arg2[%c66, %c32_13] : memref<96x64xf32, #tpu.memory_space<vmem>>, vector<1x8xf32>
    %cst_14 = arith.constant dense<0.000000e+00> : vector<16x8xf32>
    %34 = tpu.matmul %31, %32, %cst_14 {dimension_numbers = #tpu.dot_dimension_numbers<[1], [0], [0], [1], [0, 0, 1, 1], [], []>} : vector<16x16xf32>, vector<16x8xf32>, vector<16x8xf32> -> vector<16x8xf32>
    %35 = vector.broadcast %33 : vector<1x8xf32> to vector<16x8xf32>
    %36 = arith.addf %34, %35 : vector<16x8xf32>
    %cst_15 = arith.constant 0.000000e+00 : f32
    %37 = vector.broadcast %cst_15 : f32 to vector<16x8xf32>
    %38 = arith.maximumf %36, %37 : vector<16x8xf32>
    %c67 = arith.constant 67 : index
    %c32_16 = arith.constant 32 : index
    %39 = vector.load %arg2[%c67, %c32_16] : memref<96x64xf32, #tpu.memory_space<vmem>>, vector<1x8xf32>
    %c67_17 = arith.constant 67 : index
    %c40 = arith.constant 40 : index
    %40 = vector.load %arg2[%c67_17, %c40] : memref<96x64xf32, #tpu.memory_space<vmem>>, vector<1x8xf32>
    %c67_18 = arith.constant 67 : index
    %c48_19 = arith.constant 48 : index
    %41 = vector.load %arg2[%c67_18, %c48_19] : memref<96x64xf32, #tpu.memory_space<vmem>>, vector<1x1xf32>
    %42 = vector.broadcast %39 : vector<1x8xf32> to vector<16x8xf32>
    %43 = arith.mulf %38, %42 : vector<16x8xf32>
    %cst_20 = arith.constant dense<0.000000e+00> : vector<16xf32>
    %44 = vector.multi_reduction <add>, %43, %cst_20 [1] : vector<16x8xf32> to vector<16xf32>
    %45 = vector.shape_cast %44 : vector<16xf32> to vector<16x1xf32>
    %46 = vector.broadcast %40 : vector<1x8xf32> to vector<16x8xf32>
    %47 = arith.mulf %17, %46 : vector<16x8xf32>
    %cst_21 = arith.constant dense<0.000000e+00> : vector<16xf32>
    %48 = vector.multi_reduction <add>, %47, %cst_21 [1] : vector<16x8xf32> to vector<16xf32>
    %49 = vector.shape_cast %48 : vector<16xf32> to vector<16x1xf32>
    %50 = arith.addf %45, %49 : vector<16x1xf32>
    %51 = vector.broadcast %41 : vector<1x1xf32> to vector<16x1xf32>
    %52 = arith.addf %50, %51 : vector<16x1xf32>
    %53 = arith.negf %52 : vector<16x1xf32>
    %54 = math.exp %53 : vector<16x1xf32>
    %cst_22 = arith.constant 1.000000e+00 : f32
    %55 = vector.broadcast %cst_22 : f32 to vector<16x1xf32>
    %56 = arith.addf %55, %54 : vector<16x1xf32>
    %57 = arith.divf %55, %56 : vector<16x1xf32>
    %c0_23 = arith.constant 0 : index
    %c0_24 = arith.constant 0 : index
    %58 = vector.load %arg3[%c0_23, %c0_24] : memref<16x1xf32, #tpu.memory_space<vmem>>, vector<16x1xf32>
    tpu.vector_store %arg3[%c0_23, %c0_24], %57 {strides = array<i32>} : memref<16x1xf32, #tpu.memory_space<vmem>>, vector<16x1xf32>,
    return
  }
  func.func @transform_0(%arg0: i32) -> (i32, i32) {
    %c0_i32 = arith.constant 0 : i32
    %c0_i32_0 = arith.constant 0 : i32
    %c0_i32_1 = arith.constant 0 : i32
    return %c0_i32, %c0_i32_0 : i32, i32
  }
  func.func @transform_1(%arg0: i32) -> (i32, i32) {
    %c0_i32 = arith.constant 0 : i32
    %c0_i32_0 = arith.constant 0 : i32
    %c0_i32_1 = arith.constant 0 : i32
    return %c0_i32, %c0_i32_0 : i32, i32
  }
  func.func @transform_2(%arg0: i32) -> (i32, i32) {
    %c0_i32 = arith.constant 0 : i32
    %c0_i32_0 = arith.constant 0 : i32
    %c0_i32_1 = arith.constant 0 : i32
    return %c0_i32, %c0_i32_0 : i32, i32
  }
}

</mosaic_0001>

<bundles_post_ra>
// kernel: forward.1
= control target key start
LH: loop header
LB: loop body
LE: loop exit
PB: predicated region body
PF: predicated region fallthrough
CT: control target
= control target key end

     0   :  { %v703_v0 = vmov 0   ;;  %v704_v11 = vmov 1   ;;  %s705_s4 = smov 96   ;;  %v13_v30 = vlaneseq  ;;  %vm51_vm5 = vcmask 785408   ;;  %s707_s13 = smov 120   ;;  %s808_s0 = inlined_call_operand.vmem [shape: s32[16,2], index: 0, kind: input, shape index: {}]   ;;  %s809_s1 = inlined_call_operand.vmem [shape: f32[96,64], index: 1, kind: input, shape index: {}]   ;;  %s810_s2 = inlined_call_operand.vmem [shape: f32[16,1], index: 2, kind: output, shape index: {}]  }
   0x1   :  { %673 = vset.pattern.permute.xlu1 %v703_v0  ;;  %671 = vset.pattern.permute.xlu0 %v703_v0  ;;  %v12_v1 = vld [vmem:[%s808_s0 + $0x8] sm:$0xff]  ;;  %v11_v2 = vld [vmem:[%s808_s0] sm:$0xff]  ;;  %v41_v5 = vld [vmem:[%s809_s1 + $0x10] sm:$0xff]  ;;  %v706_v36 = vmov 0.0   ;;  %vm162_vm7 = vcmask 130048   ;;  %s708_s18 = smov 104  }
   0x2   :  { %v39_v3 = vld [vmem:[%s809_s1] sm:$0xff]  ;;  %19 = vperm.xlu1 %673, %v12_v1   ;;  %16 = vperm.xlu0 %671, %v11_v2   ;;  %v40_v4 = vld [vmem:[%s809_s1 + $0x8] sm:$0xff]  ;;  %v42_v6 = vld [vmem:[%s809_s1 + $0x18] sm:$0xff]  ;;  %v24_v7 = vadd.s32 32, %v12_v1  ;;  %v23_v8 = vadd.s32 32, %v11_v2  ;;  %v14_v33 = vand.u32 127, %v13_v30 }
   0x3   :  { %v623_v9 = vpack.c.bf16 %v40_v4, %v39_v3  ;;  %v627_v10 = vpack.c.bf16 %v42_v6, %v41_v5  ;;  %v43_v12 = vld [vmem:[%s809_s1 + $0x20] sm:$0xff]  ;;  %v44_v13 = vld [vmem:[%s809_s1 + $0x28] sm:$0xff]  ;;  %v45_v15 = vld [vmem:[%s809_s1 + $0x30] sm:$0xff]  ;;  %v675_v17 = vpack.i.bf16 %v40_v4, %v39_v3  ;;  %v680_v18 = vpack.i.bf16 %v42_v6, %v41_v5  ;;  %s710_s19 = smov 80  }
   0x4   :  { %v631_v14 = vpack.c.bf16 %v44_v13, %v43_v12  ;;  %v46_v16 = vld [vmem:[%s809_s1 + $0x38] sm:$0xff]  ;;  %v47_v20 = vld [vmem:[%s809_s1 + $0x40] sm:$0xff]  ;;  %v48_v21 = vld [vmem:[%s809_s1 + $0x48] sm:$0xff]  ;;  %v685_v22 = vpack.i.bf16 %v44_v13, %v43_v12  ;;  %vm273_vm8 = vcmask 261120   ;;  %vm470_vm9 = vcmask 64512  }
   0x5   :  { %624 = vmatprep.subr.bf16.mxu0 %v623_v9  ;;  %v635_v19 = vpack.c.bf16 %v46_v16, %v45_v15  ;;  %v531_v23 = vld [vmem:[%s809_s1 + $0x40] ss:$0 sm:$0xff]  ;;  %v639_v24 = vpack.c.bf16 %v48_v21, %v47_v20  ;;  %v49_v25 = vld [vmem:[%s809_s1 + $0x50] sm:$0xff]  ;;  %v50_v26 = vld [vmem:[%s809_s1 + $0x58] sm:$0xff]  ;;  %v690_v27 = vpack.i.bf16 %v46_v16, %v45_v15  ;;  %vm520_vm10 = vcmask 7168  }
   0x6   :  { %674 = vset.pattern.permute.xlu1 %v704_v11  ;;  %672 = vset.pattern.permute.xlu0 %v704_v11  ;;  %v534_v28 = vld [vmem:[%s809_s1 + $0x41] ss:$0 sm:$0xff]  ;;  %v643_v29 = vpack.c.bf16 %v50_v26, %v49_v25  ;;  %v537_v56 = vld [vmem:[%s809_s1 + $0x42] ss:$0 sm:$0xff]  ;;  %v788_v57 = vld [vmem:[%s809_s1 + $0x43] ss:$0 sm:$0xff] }
   0x7   :  { %29 = vperm.xlu1 %674, %v24_v7   ;;  %26 = vperm.xlu0 %672, %v23_v8   ;;  %s709_s1 = smov 112  }
   0x8   :  { %626 = vmatpush3.bf16.msra.mxu0 %v623_v9 }
   0x9   :  { %628 = vmatprep.subr.bf16.mxu0 %v627_v10 }
   0xb   :  { %676 = vrot.lane.b32.xlu1 %v675_v17, %s705_s4  ;;  %681 = vrot.lane.b32.xlu0 %v680_v18, %s705_s4 }
   0xc   :  { %630 = vmatpush3.bf16.msra.mxu0 %v627_v10 }
   0xd   :  { %632 = vmatprep.subr.bf16.mxu0 %v631_v14 }
   0xf   :  { %159 = vrot.lane.b32.xlu0 %v531_v23, %s705_s4  ;;  %686 = vrot.lane.b32.xlu1 %v685_v22, %s705_s4 }
  0x10   :  { %634 = vmatpush3.bf16.msra.mxu0 %v631_v14 }
  0x11   :  { %636 = vmatprep.subr.bf16.mxu0 %v635_v19 }
  0x13   :  { %270 = vrot.lane.b32.xlu0 %v534_v28, %s705_s4  ;;  %691 = vrot.lane.b32.xlu1 %v690_v27, %s705_s4 }
  0x14   :  { %638 = vmatpush3.bf16.msra.mxu0 %v635_v19 }
  0x15   :  { %640 = vmatprep.subr.bf16.mxu0 %v639_v24 }
  0x18   :  { %642 = vmatpush3.bf16.msra.mxu0 %v639_v24 }
  0x19   :  { %644 = vmatprep.subr.bf16.mxu0 %v643_v29 }
  0x1c   :  { %646 = vmatpush3.bf16.msra.mxu0 %v643_v29 }
  0x81   :  { %v17_v31 = vpop.permute.xlu0 %16  ;;  %v20_v32 = vpop.permute.xlu1 %19 }
  0x82   :  { %vm22_vm0 = vcmp.eq.s32.totalorder %v14_v33, %v20_v32  ;;  %vm21_vm3 = vcmp.eq.s32.totalorder %v14_v33, %v17_v31 }
  0x86   :  { %v30_v34 = vpop.permute.xlu1 %29  ;;  %v27_v35 = vpop.permute.xlu0 %26 }
  0x87   :  { %vm32_vm1 = vcmp.eq.s32.totalorder %v14_v33, %v30_v34  ;;  %vm31_vm2 = vcmp.eq.s32.totalorder %v14_v33, %v27_v35 }
  0x88   :  { %vm34_vm4 = vmor %vm22_vm0, %vm32_vm1 }
  0x89   :  { %vm33_vm6 = vmor %vm21_vm3, %vm31_vm2  ;;  %v528_v37 = vsel %vm34_vm4, 1.0, %v706_v36 }
  0x8a   :  { %v527_v38 = vsel %vm33_vm6, 1.0, %v706_v36  ;;  %v677_v39 = vpop.permute.xlu1 %676  ;;  %v682_v43 = vpop.permute.xlu0 %681 }
  0x8b   :  { %595 = vmatprep.mubr.msk.f32.mxu0 %vm51_vm5, %v527_v38  ;;  %v679_v40 = vunpack.i.h.bf16 %v677_v39  ;;  %v678_v41 = vunpack.i.l.bf16 %v677_v39  ;;  %v684_v44 = vunpack.i.h.bf16 %v682_v43  ;;  %v683_v45 = vunpack.i.l.bf16 %v682_v43 }
  0x8c   :  { %596 = vmatmul.mubr.msk.f32.vlgmr.msra.gmra.mrb[0].mxu0 %vm51_vm5, %v528_v37 }
  0x8d   :  { %v647_v42 = vpack.c.bf16 %v679_v40, %v678_v41  ;;  %v651_v46 = vpack.c.bf16 %v684_v44, %v683_v45 }
  0x8e   :  { %v687_v47 = vpop.permute.xlu1 %686  ;;  %v160_v59 = vpop.permute.xlu0 %159 }
  0x8f   :  { %648 = vmatprep.subr.bf16.mxu1 %v647_v42  ;;  %v689_v48 = vunpack.i.h.bf16 %v687_v47  ;;  %v688_v49 = vunpack.i.l.bf16 %v687_v47 }
  0x90   :  { %650 = vmatpush3.bf16.msra.mxu1 %v647_v42 }
  0x91   :  { %652 = vmatprep.subr.bf16.mxu1 %v651_v46  ;;  %v655_v53 = vpack.c.bf16 %v689_v48, %v688_v49 }
  0x92   :  { %v692_v51 = vpop.permute.xlu1 %691  ;;  %v271_v60 = vpop.permute.xlu0 %270 }
  0x93   :  { %v694_v54 = vunpack.i.h.bf16 %v692_v51  ;;  %v693_v55 = vunpack.i.l.bf16 %v692_v51 }
  0x95   :  { %v659_v58 = vpack.c.bf16 %v694_v54, %v693_v55 }
 0x15f   :  { %v597_v50 = vpop.f32.mrb[0].mxu0 }
 0x160   :  { %137 = vrot.lane.b32.xlu0 %v597_v50, %s707_s13  ;;  %v124_v52 = vpop.f32.mrb[1].mxu0 }
 0x161   :  { %135 = vrot.lane.b32.xlu1 %v124_v52, %s707_s13  ;;  %602 = vmatprep.mubr.msk.f32.mxu1 %vm162_vm7, %v124_v52 }
 0x162   :  { %603 = vmatmul.mubr.msk.f32.vlgmr.msra.gmra.mrb[0].mxu1 %vm162_vm7, %v597_v50 }
 0x163   :  { %654 = vmatpush3.bf16.msra.mxu1 %v651_v46 }
 0x164   :  { %373 = vrot.lane.b32.xlu0 %v537_v56, %s705_s4  ;;  %656 = vmatprep.subr.bf16.mxu1 %v655_v53 }
 0x165   :  { %477 = vrot.lane.b32.xlu1 %v788_v57, %s708_s18 }
 0x167   :  { %658 = vmatpush3.bf16.msra.mxu1 %v655_v53 }
 0x168   :  { %660 = vmatprep.subr.bf16.mxu1 %v659_v58 }
 0x169   :  { %465 = vrot.lane.b32.xlu1 %v788_v57, %s705_s4 }
 0x1d2   :  { %v138_v61 = vpop.permute.xlu0 %137 }
 0x1d3   :  { %v136_v62 = vpop.permute.xlu1 %135  ;;  %v142_v63 = vmul.f32 %v597_v50, %v138_v61 }
 0x1d4   :  { %v141_v0 = vmul.f32 %v136_v62, %v124_v52 }
 0x1d6   :  { %v374_v10 = vpop.permute.xlu0 %373 }
 0x1d7   :  { %v478_v1 = vpop.permute.xlu1 %477 }
 0x1d8   :  { %v480_v2 = vmul.f32 %v478_v1, %v141_v0  ;;  %v481_v3 = vmul.f32 %v478_v1, %v142_v63 }
 0x1da   :  { %484 = vrot.lane.b32.xlu0 %v480_v2, %s709_s1  ;;  %486 = vrot.lane.b32.xlu1 %v481_v3, %s709_s1 }
 0x1db   :  { %v466_v23 = vpop.permute.xlu1 %465 }
 0x235   :  { %v604_v4 = vpop.f32.mrb[0].mxu1 }
 0x236   :  { %v239_v5 = vadd.f32 %v604_v4, %v160_v59  ;;  %v233_v6 = vpop.f32.mrb[1].mxu1 }
 0x237   :  { %v234_v7 = vadd.f32 %v233_v6, %v160_v59 }
 0x238   :  { %v243_v9 = vmax.f32 %v239_v5, 0.0 }
 0x239   :  { %v242_v8 = vmax.f32 %v234_v7, 0.0 }
 0x23b   :  { %613 = vmatprep.mubr.msk.f32.mxu1 %vm273_vm8, %v242_v8 }
 0x23c   :  { %614 = vmatmul.mubr.msk.f32.vlgmr.msra.gmra.mrb[2].mxu1 %vm273_vm8, %v243_v9 }
 0x23d   :  { %662 = vmatpush3.bf16.msra.mxu1 %v659_v58 }
 0x24c   :  { %v485_v11 = vpop.permute.xlu0 %484  ;;  %v487_v30 = vpop.permute.xlu1 %486 }
 0x24d   :  { %v490_v12 = vsel %vm470_vm9, %v485_v11, 0.0  ;;  %v493_v31 = vsel %vm470_vm9, %v487_v30, 0.0 }
 0x24e   :  { %491 = vadd.xlane.f32.xlu0 %v490_v12 }
 0x2db   :  { %v492_v32 = vpop.xlane.xlu0 %491 }
 0x30f   :  { %v615_v13 = vpop.f32.mrb[2].mxu1 }
 0x310   :  { %v352_v14 = vadd.f32 %v615_v13, %v271_v60  ;;  %v346_v15 = vpop.f32.mrb[3].mxu1 }
 0x311   :  { %v347_v16 = vadd.f32 %v346_v15, %v271_v60 }
 0x312   :  { %v356_v18 = vmax.f32 %v352_v14, 0.0 }
 0x313   :  { %v355_v17 = vmax.f32 %v347_v16, 0.0 }
 0x315   :  { %620 = vmatprep.mubr.msk.f32.mxu1 %vm162_vm7, %v355_v17 }
 0x316   :  { %621 = vmatmul.mubr.msk.f32.vlgmr.msra.gmra.mrb[4].mxu1 %vm162_vm7, %v356_v18 }
 0x3e9   :  { %v622_v19 = vpop.f32.mrb[4].mxu1 }
 0x3ea   :  { %v454_v20 = vadd.f32 %v622_v19, %v374_v10  ;;  %v448_v21 = vpop.f32.mrb[5].mxu1 }
 0x3eb   :  { %v449_v22 = vadd.f32 %v448_v21, %v374_v10 }
 0x3ec   :  { %v458_v24 = vmax.f32 %v454_v20, 0.0 }
 0x3ed   :  { %v457_v25 = vmax.f32 %v449_v22, 0.0 }
 0x3ee   :  { %v469_v26 = vmul.f32 %v466_v23, %v458_v24 }
 0x3ef   :  { %v468_v27 = vmul.f32 %v466_v23, %v457_v25 }
 0x3f0   :  { %v474_v28 = vsel %vm470_vm9, %v469_v26, 0.0 }
 0x3f1   :  { %475 = vadd.xlane.f32.xlu1 %v474_v28  ;;  %v471_v29 = vsel %vm470_vm9, %v468_v27, 0.0 }
 0x3f2   :  { %472 = vadd.xlane.f32.xlu0 %v471_v29 }
 0x3f6   :  { %494 = vadd.xlane.f32.xlu0 %v493_v31 }
 0x47e   :  { %v476_v36 = vpop.xlane.xlu1 %475 }
 0x47f   :  { %v473_v33 = vpop.xlane.xlu0 %472 }
 0x480   :  { %v496_v34 = vadd.f32 %v492_v32, %v473_v33 }
 0x482   :  { %v498_v35 = vadd.f32 %v788_v57, %v496_v34 }
 0x483   :  { %v495_v37 = vpop.xlane.xlu0 %494 }
 0x484   :  { %v541_v38 = vmul.f32 -1.442695, %v498_v35  ;;  %v497_v39 = vadd.f32 %v495_v37, %v476_v36 }
 0x486   :  { %695 = vpow2.f32 %v541_v38  ;;  %v499_v40 = vadd.f32 %v788_v57, %v497_v39 }
 0x488   :  { %v542_v41 = vmul.f32 -1.442695, %v499_v40 }
 0x48a   :  { %697 = vpow2.f32 %v542_v41 }
 0x490   :  { %v696_v42 = vpop.eup %695 }
 0x491   :  { %v506_v43 = vadd.f32 1.0, %v696_v42 }
 0x493   :  { %699 = vrcp.f32 %v506_v43 }
 0x494   :  { %v698_v44 = vpop.eup %697 }
 0x495   :  { %v507_v45 = vadd.f32 1.0, %v698_v44 }
 0x497   :  { %701 = vrcp.f32 %v507_v45 }
 0x49d   :  { %v700_v46 = vpop.eup %699 }
 0x49e   :  { %514 = vrot.lane.b32.xlu1 %v700_v46, %s710_s19 }
 0x4a1   :  { %v702_v47 = vpop.eup %701 }
 0x4a2   :  { %516 = vrot.lane.b32.xlu0 %v702_v47, %s710_s19 }
 0x510   :  { %v515_v48 = vpop.permute.xlu1 %514 }
 0x511   :  { %521 = vst.msk [vmem:[%s810_s2] sm:$0xff] %vm520_vm10, %v515_v48 }
 0x514   :  { %v517_v49 = vpop.permute.xlu0 %516 }
 0x515   :  { %522 = vst.msk [vmem:[%s810_s2 + $0x8] sm:$0xff] %vm520_vm10, %v517_v49 }

</bundles_post_ra>
